<compile_context>
chip_gen: v7x
topology: tpu7x:2x2x1
jax: 0.10.0
libtpu: 0.0.40
codegen_flags: <defaults>
</compile_context>

<pallas_src>
import functools

import numpy as np
import jax
import jax.numpy as jnp
from jax import lax
from jax.experimental import pallas as pl
from jax.experimental.pallas import tpu as pltpu

_EPS = 1e-3                       # BatchNorm eps in torchvision BasicConv2d
_VMEM_LIMIT = 32 * 1024 * 1024    # safe on v5e/v6e (128 MiB) and v7x (64 MiB)


def _round_up(x, m):
    return (x + m - 1) // m * m


def _cdiv(a, b):
    return -(-a // b)


# --------------------------------------------------------------------------- #
# Pallas kernels
# --------------------------------------------------------------------------- #
def _conv_tap_kernel(x_ref, w_ref, s_ref, c_ref, o_ref, acc_ref, *, taps, tm, relu):
    """Direct stride-1 conv: accumulate KH*KW taps of (TM,Cin)@(Cin,Cout) on MXU.

    x_ref  : (1, Lpad, Cin)     bf16  whole flattened padded image (resident per b)
    w_ref  : (ntaps, Cin, Cout) bf16  per-tap weight matrices
    s_ref  : (1, Cout)          f32   folded-BN scale
    c_ref  : (1, Cout)          f32   folded-BN bias
    o_ref  : (1, TM, Cout)      bf16  block of the flat output
    acc_ref: (TM, Cout)         f32   scratch accumulator
    """
    base = pl.program_id(1) * tm
    a = x_ref[0, pl.ds(base + taps[0], tm), :]
    acc_ref[...] = jnp.dot(a, w_ref[0], preferred_element_type=jnp.float32)
    for idx in range(1, len(taps)):
        a = x_ref[0, pl.ds(base + taps[idx], tm), :]
        acc_ref[...] += jnp.dot(a, w_ref[idx], preferred_element_type=jnp.float32)
    y = acc_ref[...] * s_ref[...] + c_ref[...]
    if relu:
        y = jnp.maximum(y, 0.0)
    o_ref[0] = y.astype(o_ref.dtype)


def _matmul_kernel(a_ref, b_ref, s_ref, c_ref, o_ref, *, relu):
    """(TM,K)@(K,N) with K/N in a single block; fused scale/bias (+ReLU)."""
    y = jnp.dot(a_ref[...], b_ref[...], preferred_element_type=jnp.float32)
    y = y * s_ref[...] + c_ref[...]
    if relu:
        y = jnp.maximum(y, 0.0)
    o_ref[...] = y.astype(o_ref.dtype)


def _gap_kernel(x_ref, o_ref):
    # x_ref: (B, H*W, TC) bf16 -> o_ref: (B, TC) f32  (AdaptiveAvgPool2d(1))
    o_ref[...] = jnp.mean(x_ref[...].astype(jnp.float32), axis=1)


# --------------------------------------------------------------------------- #
# pallas_call builders (cached per shape)
# --------------------------------------------------------------------------- #
def _pick_conv_tm(m_flat, cin, cout):
    """Largest M tile keeping (f32 acc + bf16 tap slice) under a ~3 MiB budget."""
    cap = 4096
    while cap > 512 and cap * (cout * 4 + cin * 2) > (3 << 20):
        cap //= 2
    if m_flat <= cap:
        return m_flat                     # single full-extent block (always legal)
    t = _cdiv(m_flat, cap)
    return _round_up(_cdiv(m_flat, t), 16)


@functools.lru_cache(maxsize=None)
def _get_conv_call(b, lpad, cin, cout, taps, tm, m_flat, relu):
    ntaps = len(taps)
    kernel = functools.partial(_conv_tap_kernel, taps=taps, tm=tm, relu=relu)
    grid_m = _cdiv(m_flat, tm)
    flops = 2 * b * ntaps * m_flat * cin * cout
    bytes_accessed = 2 * (b * lpad * cin + ntaps * cin * cout + b * m_flat * cout)
    f = pl.pallas_call(
        kernel,
        out_shape=jax.ShapeDtypeStruct((b, m_flat, cout), jnp.bfloat16),
        grid_spec=pltpu.PrefetchScalarGridSpec(
            num_scalar_prefetch=0,
            grid=(b, grid_m),
            in_specs=[
                # whole padded image resident per batch element (re-used across j)
                pl.BlockSpec((1, lpad, cin), lambda i, j: (i, 0, 0)),
                pl.BlockSpec((ntaps, cin, cout), lambda i, j: (0, 0, 0)),
                pl.BlockSpec((1, cout), lambda i, j: (0, 0)),
                pl.BlockSpec((1, cout), lambda i, j: (0, 0)),
            ],
            out_specs=pl.BlockSpec((1, tm, cout), lambda i, j: (i, j, 0)),
            scratch_shapes=[pltpu.VMEM((tm, cout), jnp.float32)],
        ),
        compiler_params=pltpu.CompilerParams(
            dimension_semantics=("parallel", "parallel"),
            vmem_limit_bytes=_VMEM_LIMIT),
        cost_estimate=pl.CostEstimate(flops=flops, transcendentals=0,
                                      bytes_accessed=bytes_accessed),
    )
    return jax.jit(f)


def _pick_matmul_tm(m, k, n):
    cap = 4096
    while cap > 256 and cap * (k * 2 + n * 4) > (4 << 20):
        cap //= 2
    if m <= cap:
        return m                          # single full-extent block
    t = _cdiv(m, cap)
    return _round_up(_cdiv(m, t), 16)


@functools.lru_cache(maxsize=None)
def _get_matmul_call(m, k, n, tm, relu, out_dtype):
    kernel = functools.partial(_matmul_kernel, relu=relu)
    f = pl.pallas_call(
        kernel,
        out_shape=jax.ShapeDtypeStruct((m, n), out_dtype),
        grid_spec=pltpu.PrefetchScalarGridSpec(
            num_scalar_prefetch=0,
            grid=(_cdiv(m, tm),),
            in_specs=[
                pl.BlockSpec((tm, k), lambda i: (i, 0)),
                pl.BlockSpec((k, n), lambda i: (0, 0)),
                pl.BlockSpec((1, n), lambda i: (0, 0)),
                pl.BlockSpec((1, n), lambda i: (0, 0)),
            ],
            out_specs=pl.BlockSpec((tm, n), lambda i: (i, 0)),
        ),
        compiler_params=pltpu.CompilerParams(
            dimension_semantics=("parallel",),
            vmem_limit_bytes=_VMEM_LIMIT),
        cost_estimate=pl.CostEstimate(flops=2 * m * k * n, transcendentals=0,
                                      bytes_accessed=2 * (m * k + k * n + m * n)),
    )
    return jax.jit(f)


def fused_matmul(a, b, scale, bias, *, relu, out_dtype=jnp.bfloat16):
    """out = relu?((a @ b) * scale + bias); bf16 operands, f32 accumulate."""
    m, k = a.shape
    k2, n = b.shape
    assert k == k2
    tm = _pick_matmul_tm(m, k, n)
    call = _get_matmul_call(m, k, n, tm, relu, out_dtype)
    return call(a.astype(jnp.bfloat16), b.astype(jnp.bfloat16),
                jnp.asarray(scale, jnp.float32).reshape(1, n),
                jnp.asarray(bias, jnp.float32).reshape(1, n))


# --------------------------------------------------------------------------- #
# Convolution wrappers
# --------------------------------------------------------------------------- #
def conv2d_s1(x, w_taps, scale, bias, kh, kw, padding, relu=True):
    """Stride-1 conv + folded BN + ReLU via the direct tap-accumulation kernel.

    The padded image is flattened row-major; tap (dh, dw) is the row offset
    dh*Wp + dw of the flat image, so each tap's A operand is a contiguous slice
    of the resident VMEM image.  The KW-1 wrap-around columns per output row
    are garbage and sliced off afterwards (KW==1 convs produce none).
    """
    b, h, wd, cin = x.shape
    ntaps, _, cout = w_taps.shape
    ph, pw = padding
    hp, wp = h + 2 * ph, wd + 2 * pw
    oh, ow = hp - kh + 1, wp - kw + 1
    m_flat = oh * wp
    taps = tuple(dh * wp + dw for dh in range(kh) for dw in range(kw))
    tm = _pick_conv_tm(m_flat, cin, cout)
    grid_m = _cdiv(m_flat, tm)
    # make sure every in-kernel read (last tile + largest tap offset) is in bounds
    deficit = grid_m * tm + taps[-1] - hp * wp
    extra_rows = _cdiv(deficit, wp) if deficit > 0 else 0
    if ph or pw or extra_rows:
        x = jnp.pad(x, ((0, 0), (ph, ph + extra_rows), (pw, pw), (0, 0)))
    lpad = (hp + extra_rows) * wp
    xf = x.reshape(b, lpad, cin)
    out = _get_conv_call(b, lpad, cin, cout, taps, tm, m_flat, relu)(
        xf, w_taps, scale, bias)
    out = out.reshape(b, oh, wp, cout)
    if ow != wp:
        out = out[:, :, :ow, :]
    return out


def conv2d_im2col(x, wmat, scale, bias, kh, kw, stride, padding, relu=True):
    """Strided conv (only the 5 small stride-2 convs) via im2col + fused matmul."""
    b, h, wd, cin = x.shape
    sh, sw = stride
    ph, pw = padding
    if ph or pw:
        x = jnp.pad(x, ((0, 0), (ph, ph), (pw, pw), (0, 0)))
    hp, wp = h + 2 * ph, wd + 2 * pw
    oh = (hp - kh) // sh + 1
    ow = (wp - kw) // sw + 1
    cols = []
    for dh in range(kh):
        for dw in range(kw):
            cols.append(x[:, dh:dh + sh * (oh - 1) + 1:sh,
                          dw:dw + sw * (ow - 1) + 1:sw, :])
    patches = jnp.stack(cols, axis=3).reshape(b * oh * ow, kh * kw * cin)
    out = fused_matmul(patches, wmat, scale, bias, relu=relu)
    return out.reshape(b, oh, ow, -1)


def global_avg_pool(x):
    """x: (B, H, W, C) bf16 -> (B, C) f32, tiled over channels."""
    b, h, w, c = x.shape
    hw = h * w
    xr = x.reshape(b, hw, c)
    tc = 256 if c % 256 == 0 else (128 if c % 128 == 0 else c)
    return pl.pallas_call(
        _gap_kernel,
        out_shape=jax.ShapeDtypeStruct((b, c), jnp.float32),
        grid=(c // tc,),
        in_specs=[pl.BlockSpec((b, hw, tc), lambda i: (0, 0, i))],
        out_specs=pl.BlockSpec((b, tc), lambda i: (0, i)),
        compiler_params=pltpu.CompilerParams(
            dimension_semantics=("parallel",),
            vmem_limit_bytes=_VMEM_LIMIT),
    )(xr)


# --------------------------------------------------------------------------- #
# Pooling / resize glue (negligible fraction of compute vs. the Pallas convs)
# --------------------------------------------------------------------------- #
def max_pool_3x3_s2(x):
    return lax.reduce_window(x, jnp.asarray(-jnp.inf, x.dtype), lax.max,
                             (1, 3, 3, 1), (1, 2, 2, 1), "VALID")


def avg_pool_3x3_s1_p1(x):
    s = lax.reduce_window(x.astype(jnp.float32), 0.0, lax.add,
                          (1, 3, 3, 1), (1, 1, 1, 1),
                          [(0, 0), (1, 1), (1, 1), (0, 0)])
    return (s / 9.0).astype(x.dtype)   # count_include_pad=True (PyTorch default)


def _interp_matrix(in_size, out_size):
    # PyTorch F.interpolate(mode='bilinear', align_corners=False) source coords.
    scale = in_size / out_size
    dst = np.arange(out_size, dtype=np.float64)
    src = np.maximum((dst + 0.5) * scale - 0.5, 0.0)
    i0 = np.minimum(np.floor(src).astype(np.int64), in_size - 1)
    i1 = np.minimum(i0 + 1, in_size - 1)
    frac = (src - i0).astype(np.float32)
    m = np.zeros((out_size, in_size), np.float32)
    m[np.arange(out_size), i0] += 1.0 - frac
    m[np.arange(out_size), i1] += frac
    return jnp.asarray(m)


def bilinear_resize_nchw(x, out_h, out_w):
    """Separable bilinear resize as two Pallas matmuls (align_corners=False)."""
    b, c, h, w = x.shape
    rm = _interp_matrix(h, out_h)   # (out_h, h)
    cm = _interp_matrix(w, out_w)   # (out_w, w)
    one_w = jnp.ones((out_w,), jnp.float32)
    zero_w = jnp.zeros((out_w,), jnp.float32)
    t = fused_matmul(x.reshape(b * c * h, w), cm.T, one_w, zero_w,
                     relu=False, out_dtype=jnp.float32)
    t = t.reshape(b, c, h, out_w).transpose(0, 1, 3, 2).reshape(b * c * out_w, h)
    one_h = jnp.ones((out_h,), jnp.float32)
    zero_h = jnp.zeros((out_h,), jnp.float32)
    o = fused_matmul(t, rm.T, one_h, zero_h, relu=False, out_dtype=jnp.float32)
    return o.reshape(b, c, out_w, out_h).transpose(0, 1, 3, 2)


# --------------------------------------------------------------------------- #
# Deterministic synthetic parameters
# --------------------------------------------------------------------------- #
class ParamGen:
    """He-init conv weights + eval-mode BatchNorm folded to (scale, bias)."""

    def __init__(self, seed=0):
        self._key = jax.random.PRNGKey(seed)
        self._n = 0

    def _next(self):
        k = jax.random.fold_in(self._key, self._n)
        self._n += 1
        return k

    def conv_bn(self, cin, cout, kernel):
        kh, kw = kernel if isinstance(kernel, tuple) else (kernel, kernel)
        kw_key, kb_key = jax.random.split(self._next())
        fan_in = cin * kh * kw
        w = jax.random.normal(kw_key, (kh, kw, cin, cout), jnp.float32)
        w = w * np.sqrt(2.0 / fan_in)
        gamma = jnp.ones((cout,), jnp.float32)
        beta = 0.02 * jax.random.normal(kb_key, (cout,), jnp.float32)
        running_mean = jnp.zeros((cout,), jnp.float32)
        running_var = jnp.ones((cout,), jnp.float32)
        scale = gamma / jnp.sqrt(running_var + _EPS)
        bias = beta - running_mean * scale
        return {"w": w, "scale": scale, "bias": bias}


class BasicConv2d:
    def __init__(self, pg, cin, cout, kernel, stride=1, padding=0):
        p = pg.conv_bn(cin, cout, kernel)
        self.kh, self.kw = kernel if isinstance(kernel, tuple) else (kernel, kernel)
        self.stride = stride if isinstance(stride, tuple) else (stride, stride)
        self.padding = padding if isinstance(padding, tuple) else (padding, padding)
        w = p["w"]
        if self.stride == (1, 1):
            self.w = w.reshape(self.kh * self.kw, cin, cout).astype(jnp.bfloat16)
        else:
            self.w = w.reshape(self.kh * self.kw * cin, cout).astype(jnp.bfloat16)
        self.scale = p["scale"].reshape(1, cout).astype(jnp.float32)
        self.bias = p["bias"].reshape(1, cout).astype(jnp.float32)

    def __call__(self, x):
        if self.stride == (1, 1):
            return conv2d_s1(x, self.w, self.scale, self.bias,
                             self.kh, self.kw, self.padding)
        return conv2d_im2col(x, self.w, self.scale, self.bias,
                             self.kh, self.kw, self.stride, self.padding)


class InceptionA:
    def __init__(self, pg, cin, pool_features):
        self.branch1x1 = BasicConv2d(pg, cin, 64, 1)
        self.branch5x5_1 = BasicConv2d(pg, cin, 48, 1)
        self.branch5x5_2 = BasicConv2d(pg, 48, 64, 5, padding=2)
        self.branch3x3dbl_1 = BasicConv2d(pg, cin, 64, 1)
        self.branch3x3dbl_2 = BasicConv2d(pg, 64, 96, 3, padding=1)
        self.branch3x3dbl_3 = BasicConv2d(pg, 96, 96, 3, padding=1)
        self.branch_pool = BasicConv2d(pg, cin, pool_features, 1)

    def __call__(self, x):
        b1 = self.branch1x1(x)
        b5 = self.branch5x5_2(self.branch5x5_1(x))
        b3 = self.branch3x3dbl_3(self.branch3x3dbl_2(self.branch3x3dbl_1(x)))
        bp = self.branch_pool(avg_pool_3x3_s1_p1(x))
        return jnp.concatenate([b1, b5, b3, bp], axis=-1)


class InceptionB:
    def __init__(self, pg, cin):
        self.branch3x3 = BasicConv2d(pg, cin, 384, 3, stride=2)
        self.branch3x3dbl_1 = BasicConv2d(pg, cin, 64, 1)
        self.branch3x3dbl_2 = BasicConv2d(pg, 64, 96, 3, padding=1)
        self.branch3x3dbl_3 = BasicConv2d(pg, 96, 96, 3, stride=2)

    def __call__(self, x):
        b3 = self.branch3x3(x)
        bd = self.branch3x3dbl_3(self.branch3x3dbl_2(self.branch3x3dbl_1(x)))
        bp = max_pool_3x3_s2(x)
        return jnp.concatenate([b3, bd, bp], axis=-1)


class InceptionC:
    def __init__(self, pg, cin, c7):
        self.branch1x1 = BasicConv2d(pg, cin, 192, 1)
        self.branch7x7_1 = BasicConv2d(pg, cin, c7, 1)
        self.branch7x7_2 = BasicConv2d(pg, c7, c7, (1, 7), padding=(0, 3))
        self.branch7x7_3 = BasicConv2d(pg, c7, 192, (7, 1), padding=(3, 0))
        self.branch7x7dbl_1 = BasicConv2d(pg, cin, c7, 1)
        self.branch7x7dbl_2 = BasicConv2d(pg, c7, c7, (7, 1), padding=(3, 0))
        self.branch7x7dbl_3 = BasicConv2d(pg, c7, c7, (1, 7), padding=(0, 3))
        self.branch7x7dbl_4 = BasicConv2d(pg, c7, c7, (7, 1), padding=(3, 0))
        self.branch7x7dbl_5 = BasicConv2d(pg, c7, 192, (1, 7), padding=(0, 3))
        self.branch_pool = BasicConv2d(pg, cin, 192, 1)

    def __call__(self, x):
        b1 = self.branch1x1(x)
        b7 = self.branch7x7_3(self.branch7x7_2(self.branch7x7_1(x)))
        bd = self.branch7x7dbl_5(self.branch7x7dbl_4(self.branch7x7dbl_3(
            self.branch7x7dbl_2(self.branch7x7dbl_1(x)))))
        bp = self.branch_pool(avg_pool_3x3_s1_p1(x))
        return jnp.concatenate([b1, b7, bd, bp], axis=-1)


class InceptionD:
    def __init__(self, pg, cin):
        self.branch3x3_1 = BasicConv2d(pg, cin, 192, 1)
        self.branch3x3_2 = BasicConv2d(pg, 192, 320, 3, stride=2)
        self.branch7x7x3_1 = BasicConv2d(pg, cin, 192, 1)
        self.branch7x7x3_2 = BasicConv2d(pg, 192, 192, (1, 7), padding=(0, 3))
        self.branch7x7x3_3 = BasicConv2d(pg, 192, 192, (7, 1), padding=(3, 0))
        self.branch7x7x3_4 = BasicConv2d(pg, 192, 192, 3, stride=2)

    def __call__(self, x):
        b3 = self.branch3x3_2(self.branch3x3_1(x))
        b7 = self.branch7x7x3_4(self.branch7x7x3_3(
            self.branch7x7x3_2(self.branch7x7x3_1(x))))
        bp = max_pool_3x3_s2(x)
        return jnp.concatenate([b3, b7, bp], axis=-1)


class InceptionE:
    def __init__(self, pg, cin):
        self.branch1x1 = BasicConv2d(pg, cin, 320, 1)
        self.branch3x3_1 = BasicConv2d(pg, cin, 384, 1)
        self.branch3x3_2a = BasicConv2d(pg, 384, 384, (1, 3), padding=(0, 1))
        self.branch3x3_2b = BasicConv2d(pg, 384, 384, (3, 1), padding=(1, 0))
        self.branch3x3dbl_1 = BasicConv2d(pg, cin, 448, 1)
        self.branch3x3dbl_2 = BasicConv2d(pg, 448, 384, 3, padding=1)
        self.branch3x3dbl_3a = BasicConv2d(pg, 384, 384, (1, 3), padding=(0, 1))
        self.branch3x3dbl_3b = BasicConv2d(pg, 384, 384, (3, 1), padding=(1, 0))
        self.branch_pool = BasicConv2d(pg, cin, 192, 1)

    def __call__(self, x):
        b1 = self.branch1x1(x)
        b3 = self.branch3x3_1(x)
        b3 = jnp.concatenate([self.branch3x3_2a(b3), self.branch3x3_2b(b3)], axis=-1)
        bd = self.branch3x3dbl_2(self.branch3x3dbl_1(x))
        bd = jnp.concatenate([self.branch3x3dbl_3a(bd), self.branch3x3dbl_3b(bd)],
                             axis=-1)
        bp = self.branch_pool(avg_pool_3x3_s1_p1(x))
        return jnp.concatenate([b1, b3, bd, bp], axis=-1)


class InceptionV3Features:
    """JAX/Pallas port of torchvision inception_v3 (eval, fc=Identity)."""

    def __init__(self, seed=0):
        pg = ParamGen(seed)
        self.Conv2d_1a_3x3 = BasicConv2d(pg, 3, 32, 3, stride=2)
        self.Conv2d_2a_3x3 = BasicConv2d(pg, 32, 32, 3)
        self.Conv2d_2b_3x3 = BasicConv2d(pg, 32, 64, 3, padding=1)
        self.Conv2d_3b_1x1 = BasicConv2d(pg, 64, 80, 1)
        self.Conv2d_4a_3x3 = BasicConv2d(pg, 80, 192, 3)
        self.Mixed_5b = InceptionA(pg, 192, 32)
        self.Mixed_5c = InceptionA(pg, 256, 64)
        self.Mixed_5d = InceptionA(pg, 288, 64)
        self.Mixed_6a = InceptionB(pg, 288)
        self.Mixed_6b = InceptionC(pg, 768, 128)
        self.Mixed_6c = InceptionC(pg, 768, 160)
        self.Mixed_6d = InceptionC(pg, 768, 160)
        self.Mixed_6e = InceptionC(pg, 768, 192)
        self.Mixed_7a = InceptionD(pg, 768)
        self.Mixed_7b = InceptionE(pg, 1280)
        self.Mixed_7c = InceptionE(pg, 2048)

    def __call__(self, x):
        # x: (B, 3, H, W) in [-1, 1], NCHW (same as the PyTorch module).
        if x.shape[2] != 299 or x.shape[3] != 299:
            x = bilinear_resize_nchw(x, 299, 299)
        # transform_input (torchvision enables it with pretrained weights)
        ch0 = x[:, 0:1] * (0.229 / 0.5) + (0.485 - 0.5) / 0.5
        ch1 = x[:, 1:2] * (0.224 / 0.5) + (0.456 - 0.5) / 0.5
        ch2 = x[:, 2:3] * (0.225 / 0.5) + (0.406 - 0.5) / 0.5
        x = jnp.concatenate([ch0, ch1, ch2], axis=1)
        x = jnp.transpose(x, (0, 2, 3, 1)).astype(jnp.bfloat16)   # -> NHWC bf16
        x = self.Conv2d_1a_3x3(x)                   # 149x149x32
        x = self.Conv2d_2a_3x3(x)                   # 147x147x32
        x = self.Conv2d_2b_3x3(x)                   # 147x147x64
        x = max_pool_3x3_s2(x)                      # 73x73x64
        x = self.Conv2d_3b_1x1(x)                   # 73x73x80
        x = self.Conv2d_4a_3x3(x)                   # 71x71x192
        x = max_pool_3x3_s2(x)                      # 35x35x192
        x = self.Mixed_5b(x)                        # 35x35x256
        x = self.Mixed_5c(x)                        # 35x35x288
        x = self.Mixed_5d(x)                        # 35x35x288
        x = self.Mixed_6a(x)                        # 17x17x768
        x = self.Mixed_6b(x)
        x = self.Mixed_6c(x)
        x = self.Mixed_6d(x)
        x = self.Mixed_6e(x)                        # 17x17x768
        x = self.Mixed_7a(x)                        # 8x8x1280
        x = self.Mixed_7b(x)                        # 8x8x2048
        x = self.Mixed_7c(x)                        # 8x8x2048
        # AdaptiveAvgPool2d(1) + Dropout(eval) + flatten + fc=Identity
        return global_avg_pool(x)                   # (B, 2048) f32


if __name__ == "__main__":
    key = jax.random.PRNGKey(0)
    x = jax.random.uniform(key, (2, 3, 16, 16), jnp.float32,
                           minval=-1.0, maxval=1.0)
    model = InceptionV3Features(seed=0)
    feats = model(x)
    feats = jax.block_until_ready(feats)
    assert feats.shape == (2, 2048) and feats.dtype == jnp.float32
    assert bool(jnp.all(jnp.isfinite(feats)))
    print("KERNEL_OK")
</pallas_src>

<mosaic_0001>
module attributes {stable_mosaic.version = 11 : i64} {
  func.func @_matmul_kernel(%arg0: i32, %arg1: memref<96x16xbf16, #tpu.memory_space<vmem>>, %arg2: memref<16x299xbf16, #tpu.memory_space<vmem>>, %arg3: memref<1x299xf32, #tpu.memory_space<vmem>>, %arg4: memref<1x299xf32, #tpu.memory_space<vmem>>, %arg5: memref<96x299xf32, #tpu.memory_space<vmem>>) attributes {dimension_semantics = [#tpu.dimension_semantics<parallel>], iteration_bounds = array<i64: 1>, scalar_prefetch = 0 : i64, scratch_operands = 0 : i64, tpu.core_type = #tpu.core_type<tc>, window_params = [{transform_indices = @transform_0, window_bounds = array<i64: 96, 16>}, {pipeline_mode = #tpu.pipeline_mode<synchronous>, transform_indices = @transform_1, window_bounds = array<i64: 16, 299>}, {pipeline_mode = #tpu.pipeline_mode<synchronous>, transform_indices = @transform_2, window_bounds = array<i64: 1, 299>}, {pipeline_mode = #tpu.pipeline_mode<synchronous>, transform_indices = @transform_3, window_bounds = array<i64: 1, 299>}, {transform_indices = @transform_4, window_bounds = array<i64: 96, 299>}]} {
    %c0 = arith.constant 0 : index
    %c0_0 = arith.constant 0 : index
    %0 = vector.load %arg1[%c0, %c0_0] : memref<96x16xbf16, #tpu.memory_space<vmem>>, vector<96x16xbf16>
    %c0_1 = arith.constant 0 : index
    %c0_2 = arith.constant 0 : index
    %1 = vector.load %arg2[%c0_1, %c0_2] : memref<16x299xbf16, #tpu.memory_space<vmem>>, vector<16x299xbf16>
    %cst = arith.constant dense<0.000000e+00> : vector<96x299xf32>
    %2 = tpu.matmul %0, %1, %cst {dimension_numbers = #tpu.dot_dimension_numbers<[1], [0], [0], [1], [0, 0, 1, 1], [], []>} : vector<96x16xbf16>, vector<16x299xbf16>, vector<96x299xf32> -> vector<96x299xf32>
    %c0_3 = arith.constant 0 : index
    %c0_4 = arith.constant 0 : index
    %3 = vector.load %arg3[%c0_3, %c0_4] : memref<1x299xf32, #tpu.memory_space<vmem>>, vector<1x299xf32>
    %4 = vector.broadcast %3 : vector<1x299xf32> to vector<96x299xf32>
    %5 = arith.mulf %2, %4 : vector<96x299xf32>
    %c0_5 = arith.constant 0 : index
    %c0_6 = arith.constant 0 : index
    %6 = vector.load %arg4[%c0_5, %c0_6] : memref<1x299xf32, #tpu.memory_space<vmem>>, vector<1x299xf32>
    %7 = vector.broadcast %6 : vector<1x299xf32> to vector<96x299xf32>
    %8 = arith.addf %5, %7 : vector<96x299xf32>
    %c0_7 = arith.constant 0 : index
    %c0_8 = arith.constant 0 : index
    %9 = vector.load %arg5[%c0_7, %c0_8] : memref<96x299xf32, #tpu.memory_space<vmem>>, vector<96x299xf32>
    tpu.vector_store %arg5[%c0_7, %c0_8], %8 {strides = array<i32>} : memref<96x299xf32, #tpu.memory_space<vmem>>, vector<96x299xf32>,
    return
  }
  func.func @transform_0(%arg0: i32) -> (i32, i32) {
    %c0_i32 = arith.constant 0 : i32
    %c0_i32_0 = arith.constant 0 : i32
    return %arg0, %c0_i32 : i32, i32
  }
  func.func @transform_1(%arg0: i32) -> (i32, i32) {
    %c0_i32 = arith.constant 0 : i32
    %c0_i32_0 = arith.constant 0 : i32
    %c0_i32_1 = arith.constant 0 : i32
    return %c0_i32, %c0_i32_0 : i32, i32
  }
  func.func @transform_2(%arg0: i32) -> (i32, i32) {
    %c0_i32 = arith.constant 0 : i32
    %c0_i32_0 = arith.constant 0 : i32
    %c0_i32_1 = arith.constant 0 : i32
    return %c0_i32, %c0_i32_0 : i32, i32
  }
  func.func @transform_3(%arg0: i32) -> (i32, i32) {
    %c0_i32 = arith.constant 0 : i32
    %c0_i32_0 = arith.constant 0 : i32
    %c0_i32_1 = arith.constant 0 : i32
    return %c0_i32, %c0_i32_0 : i32, i32
  }
  func.func @transform_4(%arg0: i32) -> (i32, i32) {
    %c0_i32 = arith.constant 0 : i32
    %c0_i32_0 = arith.constant 0 : i32
    return %arg0, %c0_i32 : i32, i32
  }
}

</mosaic_0001>

<bundles_post_ra>
// kernel: tpu_custom_call.1
= control target key start
LH: loop header
LB: loop body
LE: loop exit
PB: predicated region body
PF: predicated region fallthrough
CT: control target
= control target key end

     0   :  { %v515_v2 = vmov 0   ;;  %vm81_vm0 = vcmask 130048   ;;  %s697_s0 = inlined_call_operand.vmem [shape: bf16[96,16], index: 0, kind: input, shape index: {}]   ;;  %s698_s1 = inlined_call_operand.vmem [shape: bf16[16,299], index: 1, kind: input, shape index: {}]   ;;  %s699_s2 = inlined_call_operand.vmem [shape: f32[1,299], index: 2, kind: input, shape index: {}]   ;;  %s700_s3 = inlined_call_operand.vmem [shape: f32[1,299], index: 3, kind: input, shape index: {}]   ;;  %s701_s4 = inlined_call_operand.hbm [shape: f32[96,299], index: 4, kind: output, shape index: {}]  }
   0x1   :  { %v481_v0 = vld [vmem:[%s698_s1 + $0x4] ss:$12 sps:$4 sm:$0xff]   ;;  %v483_v1 = vld [vmem:[%s698_s1] ss:$12 sps:$4 sm:$0xff]   ;;  %132 = vmatprep.mubr.bf16.mxu0 %v515_v2  ;;  %182 = vmatprep.mubr.bf16.mxu1 %v515_v2  ;;  %v486_v5 = vld [vmem:[%s698_s1 + $0x8] ss:$12 sps:$4 sm:$0xff]  }
   0x2   :  { %100 = vmatprep.subr.bf16.mxu0 %v481_v0  ;;  %v484_v3 = vld [vmem:[%s697_s0] sm:$0xff]   ;;  %475 = vmatprep.subr.bf16.mxu1 %v481_v0  ;;  %v485_v4 = vld [vmem:[%s697_s0 + $0x28] sm:$0xff]  }
   0x3   :  { %101 = vmatpush1.bf16.msra.mxu0 %v483_v1  ;;  %476 = vmatpush1.bf16.msra.mxu1 %v483_v1 }
   0x4   :  { %461 = vmatprep.subr.bf16.mxu1 %v486_v5 }
   0x6   :  { %442 = vmatmul.mubr.msk.bf16.vlgmr.msra.gmra.mrb[0].mxu0 %vm81_vm0, %v484_v3  ;;  %447 = vmatmul.mubr.msk.bf16.vlgmr.msra.gmra.mrb[0].mxu1 %vm81_vm0, %v485_v4 }
   0x7   :  { %142 = vmatprep.mubr.bf16.mxu0 %v515_v2  ;;  %462 = vmatpush3.bf16.msra.mxu1 %v486_v5 }
   0x8   :  { %463 = vmatprep.mubr.msk.bf16.mxu1 %vm81_vm0, %v484_v3 }
   0x9   :  { %9 = vsyncpa [#allocation3], 0  ;;  %v487_v6 = vld [vmem:[%s697_s0 + $0x8] sm:$0xff]   ;;  %v488_v7 = vld [vmem:[%s697_s0 + $0x10] sm:$0xff]   ;;  %v276_v10 = vlaneseq  ;;  %vm382_vm1 = vcmask 351232  }
   0xa   :  { %v489_v8 = vld [vmem:[%s697_s0 + $0x18] sm:$0xff]   ;;  %v490_v9 = vld [vmem:[%s697_s0 + $0x20] sm:$0xff]  }
   0xb   :  { %v277_v11 = vshrl.u32 %v276_v10, 7  ;;  %v274_v13 = vld [vmem:[%s699_s2] sm:$0x7]  ;;  %s516_s2 = smov [#allocation2]  }
   0xc   :  { %v327_v15 = vld [vmem:[%s700_s3] sm:$0x7]  ;;  %s422_s3 = sshll.u32 %s516_s2, 4  ;;  %s423_s3 = int_to_ptr.vmem [resolvable:$true] %s422_s3 }
   0xd   :  { %v278_v12 = vsub.s32 0, %v277_v11  ;;  %v282_v14 = vsub.s32 1, %v277_v11  ;;  %v286_v26 = vsub.s32 2, %v277_v11  ;;  %s491_s9 = scalar_lea.vmem %s423_s3, 4608  ;;  %p496_p1 = scmp.lt.s32.totalorder %s423_s3, %s423_s3 }
   0xe   :  { %443 = vmatmul.mubr.msk.bf16.gmra.mrb[4].mxu0 %vm81_vm0, %v487_v6  ;;  %464 = vmatmul.mubr.msk.bf16.vlgmr.msra.gmra.mrb[4].mxu1 %vm81_vm0, %v487_v6  ;;  %p492_p0 = scmp.ne.s32.totalorder %s423_s3, %s491_s9  ;;  %p497_p2 = scmp.lt.s32.totalorder %s491_s9, %s491_s9 }
   0xf   :  { %152 = vmatprep.mubr.bf16.mxu0 %v515_v2  ;;  %467 = vmatprep.mubr.msk.bf16.mxu1 %vm81_vm0, %v488_v7  ;;  %v589_v16 = vrot.slane %v274_v13, %v278_v12  ;;  %v591_v17 = vrot.slane %v274_v13, %v282_v14  ;;  %v593_v18 = vrot.slane %v327_v15, %v278_v12 }
  0x10   :  { %v595_v20 = vrot.slane %v327_v15, %v282_v14  ;;  %v611_v43 = vrot.slane %v274_v13, %v286_v26  ;;  %v615_v46 = vrot.slane %v327_v15, %v286_v26  ;;  %p498_p3 = por %p497_p2, %p496_p1 }
  0x12   :  { %p499_p4 = pnand %p498_p3, %p492_p0 }
  0x16   :  { %444 = vmatmul.mubr.msk.bf16.gmra.mrb[8].mxu0 %vm81_vm0, %v488_v7  ;;  %468 = vmatmul.mubr.msk.bf16.gmra.mrb[8].mxu1 %vm81_vm0, %v489_v8 }
  0x17   :  { %162 = vmatprep.mubr.bf16.mxu0 %v515_v2  ;;  %471 = vmatprep.mubr.msk.bf16.mxu1 %vm81_vm0, %v490_v9 }
  0x1e   :  { %445 = vmatmul.mubr.msk.bf16.gmra.mrb[12].mxu0 %vm81_vm0, %v489_v8  ;;  %472 = vmatmul.mubr.msk.bf16.gmra.mrb[12].mxu1 %vm81_vm0, %v485_v4 }
  0x1f   :  { %172 = vmatprep.mubr.bf16.mxu0 %v515_v2 }
  0x26   :  { %446 = vmatmul.mubr.msk.bf16.gmra.mrb[16].mxu0 %vm81_vm0, %v490_v9 }
  0xd9   :  { %v134_v19 = vpop.f32.mrb[0].mxu0  ;;  %v184_v21 = vpop.f32.mrb[0].mxu1 }
  0xda   :  { %v291_v22 = vmul.f32 %v589_v16, %v134_v19  ;;  %v136_v23 = vpop.f32.mrb[1].mxu0  ;;  %v321_v24 = vmul.f32 %v589_v16, %v184_v21  ;;  %v186_v25 = vpop.f32.mrb[1].mxu1 }
  0xdb   :  { %v292_v27 = vmul.f32 %v591_v17, %v136_v23  ;;  %v138_v28 = vpop.f32.mrb[2].mxu0  ;;  %v322_v29 = vmul.f32 %v591_v17, %v186_v25  ;;  %v188_v30 = vpop.f32.mrb[2].mxu1 }
  0xdc   :  { %v344_v31 = vadd.f32 %v593_v18, %v291_v22  ;;  %v294_v32 = vmul.f32 %v589_v16, %v138_v28  ;;  %v140_v33 = vpop.f32.mrb[3].mxu0  ;;  %v374_v34 = vadd.f32 %v593_v18, %v321_v24  ;;  %v324_v35 = vmul.f32 %v589_v16, %v188_v30  ;;  %v190_v36 = vpop.f32.mrb[3].mxu1 }
  0xdd   :  { %v345_v37 = vadd.f32 %v595_v20, %v292_v27  ;;  %v295_v38 = vmul.f32 %v591_v17, %v140_v33  ;;  %v375_v39 = vadd.f32 %v595_v20, %v322_v29  ;;  %v325_v40 = vmul.f32 %v591_v17, %v190_v36 }
  0xde   :  { %380 = vst [vmem:[#allocation2] sm:$0xff] %v344_v31  ;;  %v347_v41 = vadd.f32 %v593_v18, %v294_v32  ;;  %411 = vst [vmem:[#allocation2 + $0xf0] sm:$0xff] %v374_v34  ;;  %v377_v42 = vadd.f32 %v593_v18, %v324_v35 }
  0xdf   :  { %381 = vst [vmem:[#allocation2 + $0x8] sm:$0xff] %v345_v37  ;;  %v348_v44 = vadd.f32 %v595_v20, %v295_v38  ;;  %412 = vst [vmem:[#allocation2 + $0xf8] sm:$0xff] %v375_v39  ;;  %v378_v45 = vadd.f32 %v595_v20, %v325_v40 }
  0xe0   :  { %384 = vst [vmem:[#allocation2 + $0x18] sm:$0xff] %v347_v41  ;;  %414 = vst [vmem:[#allocation2 + $0x108] sm:$0xff] %v377_v42 }
  0xe1   :  { %385 = vst [vmem:[#allocation2 + $0x20] sm:$0xff] %v348_v44  ;;  %v144_v47 = vpop.f32.mrb[4].mxu0  ;;  %415 = vst [vmem:[#allocation2 + $0x110] sm:$0xff] %v378_v45  ;;  %v465_v48 = vpop.f32.mrb[4].mxu1 }
  0xe2   :  { %v297_v49 = vmul.f32 %v589_v16, %v144_v47  ;;  %v146_v50 = vpop.f32.mrb[5].mxu0  ;;  %v299_v51 = vmul.f32 %v465_v48, %v611_v43  ;;  %v227_v52 = vpop.f32.mrb[5].mxu1 }
  0xe3   :  { %v298_v53 = vmul.f32 %v591_v17, %v146_v50  ;;  %v148_v54 = vpop.f32.mrb[6].mxu0  ;;  %v293_v55 = vmul.f32 %v611_v43, %v227_v52  ;;  %v466_v56 = vpop.f32.mrb[6].mxu1 }
  0xe4   :  { %v350_v57 = vadd.f32 %v593_v18, %v297_v49  ;;  %v300_v58 = vmul.f32 %v589_v16, %v148_v54  ;;  %v150_v59 = vpop.f32.mrb[7].mxu0  ;;  %v352_v60 = vadd.f32 %v615_v46, %v299_v51  ;;  %v302_v61 = vmul.f32 %v466_v56, %v611_v43  ;;  %v230_v62 = vpop.f32.mrb[7].mxu1 }
  0xe5   :  { %v351_v63 = vadd.f32 %v595_v20, %v298_v53  ;;  %v301_v0 = vmul.f32 %v591_v17, %v150_v59  ;;  %v346_v1 = vadd.f32 %v615_v46, %v293_v55  ;;  %v296_v2 = vmul.f32 %v611_v43, %v230_v62 }
  0xe6   :  { %387 = vst [vmem:[#allocation2 + $0x30] sm:$0xff] %v350_v57  ;;  %v353_v3 = vadd.f32 %v593_v18, %v300_v58  ;;  %389 = vst.msk [vmem:[#allocation2 + $0x40] sm:$0xff] %vm382_vm1, %v352_v60  ;;  %v355_v4 = vadd.f32 %v615_v46, %v302_v61 }
  0xe7   :  { %388 = vst [vmem:[#allocation2 + $0x38] sm:$0xff] %v351_v63  ;;  %v354_v5 = vadd.f32 %v595_v20, %v301_v0  ;;  %383 = vst.msk [vmem:[#allocation2 + $0x10] sm:$0xff] %vm382_vm1, %v346_v1  ;;  %v349_v6 = vadd.f32 %v615_v46, %v296_v2 }
  0xe8   :  { %390 = vst [vmem:[#allocation2 + $0x48] sm:$0xff] %v353_v3  ;;  %392 = vst.msk [vmem:[#allocation2 + $0x58] sm:$0xff] %vm382_vm1, %v355_v4 }
  0xe9   :  { %391 = vst [vmem:[#allocation2 + $0x50] sm:$0xff] %v354_v5  ;;  %v154_v7 = vpop.f32.mrb[8].mxu0  ;;  %386 = vst.msk [vmem:[#allocation2 + $0x28] sm:$0xff] %vm382_vm1, %v349_v6  ;;  %v469_v8 = vpop.f32.mrb[8].mxu1 }
  0xea   :  { %v303_v9 = vmul.f32 %v589_v16, %v154_v7  ;;  %v156_v10 = vpop.f32.mrb[9].mxu0  ;;  %v311_v11 = vmul.f32 %v469_v8, %v611_v43  ;;  %v243_v12 = vpop.f32.mrb[9].mxu1 }
  0xeb   :  { %v304_v13 = vmul.f32 %v591_v17, %v156_v10  ;;  %v158_v14 = vpop.f32.mrb[10].mxu0  ;;  %v305_v15 = vmul.f32 %v611_v43, %v243_v12  ;;  %v470_v19 = vpop.f32.mrb[10].mxu1 }
  0xec   :  { %v356_v21 = vadd.f32 %v593_v18, %v303_v9  ;;  %v306_v22 = vmul.f32 %v589_v16, %v158_v14  ;;  %v160_v23 = vpop.f32.mrb[11].mxu0  ;;  %v364_v24 = vadd.f32 %v615_v46, %v311_v11  ;;  %v314_v25 = vmul.f32 %v470_v19, %v611_v43  ;;  %v246_v26 = vpop.f32.mrb[11].mxu1 }
  0xed   :  { %v357_v27 = vadd.f32 %v595_v20, %v304_v13  ;;  %v307_v28 = vmul.f32 %v591_v17, %v160_v23  ;;  %v358_v29 = vadd.f32 %v615_v46, %v305_v15  ;;  %v308_v30 = vmul.f32 %v611_v43, %v246_v26 }
  0xee   :  { %393 = vst [vmem:[#allocation2 + $0x60] sm:$0xff] %v356_v21  ;;  %v359_v31 = vadd.f32 %v593_v18, %v306_v22  ;;  %401 = vst.msk [vmem:[#allocation2 + $0xa0] sm:$0xff] %vm382_vm1, %v364_v24  ;;  %v367_v32 = vadd.f32 %v615_v46, %v314_v25 }
  0xef   :  { %394 = vst [vmem:[#allocation2 + $0x68] sm:$0xff] %v357_v27  ;;  %v360_v33 = vadd.f32 %v595_v20, %v307_v28  ;;  %395 = vst.msk [vmem:[#allocation2 + $0x70] sm:$0xff] %vm382_vm1, %v358_v29  ;;  %v361_v34 = vadd.f32 %v615_v46, %v308_v30 }
  0xf0   :  { %396 = vst [vmem:[#allocation2 + $0x78] sm:$0xff] %v359_v31  ;;  %404 = vst.msk [vmem:[#allocation2 + $0xb8] sm:$0xff] %vm382_vm1, %v367_v32 }
  0xf1   :  { %397 = vst [vmem:[#allocation2 + $0x80] sm:$0xff] %v360_v33  ;;  %v164_v35 = vpop.f32.mrb[12].mxu0  ;;  %398 = vst.msk [vmem:[#allocation2 + $0x88] sm:$0xff] %vm382_vm1, %v361_v34  ;;  %v473_v36 = vpop.f32.mrb[12].mxu1 }
  0xf2   :  { %v309_v37 = vmul.f32 %v589_v16, %v164_v35  ;;  %v166_v38 = vpop.f32.mrb[13].mxu0  ;;  %v323_v39 = vmul.f32 %v473_v36, %v611_v43  ;;  %v259_v40 = vpop.f32.mrb[13].mxu1 }
  0xf3   :  { %v310_v41 = vmul.f32 %v591_v17, %v166_v38  ;;  %v168_v42 = vpop.f32.mrb[14].mxu0  ;;  %v317_v44 = vmul.f32 %v611_v43, %v259_v40  ;;  %v474_v45 = vpop.f32.mrb[14].mxu1 }
  0xf4   :  { %v362_v47 = vadd.f32 %v593_v18, %v309_v37  ;;  %v312_v48 = vmul.f32 %v589_v16, %v168_v42  ;;  %v170_v49 = vpop.f32.mrb[15].mxu0  ;;  %v376_v50 = vadd.f32 %v615_v46, %v323_v39  ;;  %v326_v51 = vmul.f32 %v474_v45, %v611_v43  ;;  %v262_v52 = vpop.f32.mrb[15].mxu1 }
  0xf5   :  { %v363_v53 = vadd.f32 %v595_v20, %v310_v41  ;;  %v313_v54 = vmul.f32 %v591_v17, %v170_v49  ;;  %v370_v55 = vadd.f32 %v615_v46, %v317_v44  ;;  %v320_v56 = vmul.f32 %v611_v43, %v262_v52 }
  0xf6   :  { %399 = vst [vmem:[#allocation2 + $0x90] sm:$0xff] %v362_v47  ;;  %v365_v57 = vadd.f32 %v593_v18, %v312_v48  ;;  %413 = vst.msk [vmem:[#allocation2 + $0x100] sm:$0xff] %vm382_vm1, %v376_v50  ;;  %v379_v58 = vadd.f32 %v615_v46, %v326_v51 }
  0xf7   :  { %400 = vst [vmem:[#allocation2 + $0x98] sm:$0xff] %v363_v53  ;;  %v366_v59 = vadd.f32 %v595_v20, %v313_v54  ;;  %407 = vst.msk [vmem:[#allocation2 + $0xd0] sm:$0xff] %vm382_vm1, %v370_v55  ;;  %v373_v60 = vadd.f32 %v615_v46, %v320_v56 }
  0xf8   :  { %402 = vst [vmem:[#allocation2 + $0xa8] sm:$0xff] %v365_v57  ;;  %416 = vst.msk [vmem:[#allocation2 + $0x118] sm:$0xff] %vm382_vm1, %v379_v58 }
  0xf9   :  { %403 = vst [vmem:[#allocation2 + $0xb0] sm:$0xff] %v366_v59  ;;  %v174_v61 = vpop.f32.mrb[16].mxu0  ;;  %410 = vst.msk [vmem:[#allocation2 + $0xe8] sm:$0xff] %vm382_vm1, %v373_v60 }
  0xfa   :  { %v315_v43 = vmul.f32 %v589_v16, %v174_v61  ;;  %v176_v62 = vpop.f32.mrb[17].mxu0 }
  0xfb   :  { %v316_v63 = vmul.f32 %v591_v17, %v176_v62  ;;  %v178_v0 = vpop.f32.mrb[18].mxu0 }
  0xfc   :  { %v368_v1 = vadd.f32 %v593_v18, %v315_v43  ;;  %v318_v2 = vmul.f32 %v589_v16, %v178_v0  ;;  %v180_v46 = vpop.f32.mrb[19].mxu0 }
  0xfd   :  { %v369_v3 = vadd.f32 %v595_v20, %v316_v63  ;;  %v319_v4 = vmul.f32 %v591_v17, %v180_v46 }
  0xfe   :  { %405 = vst [vmem:[#allocation2 + $0xc0] sm:$0xff] %v368_v1  ;;  %v371_v5 = vadd.f32 %v593_v18, %v318_v2 }
  0xff   :  { %406 = vst [vmem:[#allocation2 + $0xc8] sm:$0xff] %v369_v3  ;;  %v372_v6 = vadd.f32 %v595_v20, %v319_v4 }
 0x100   :  { %408 = vst [vmem:[#allocation2 + $0xd8] sm:$0xff] %v371_v5 }
 0x101   :  { %409 = vst [vmem:[#allocation2 + $0xe0] sm:$0xff] %v372_v6 }
 0x102   :  { %502 = shalt.err (!%p499_p4)
}
 0x103   :  { %s503_s12 = scalar_lea.hbm %s701_s4, 4608 }
 0x104   :  { %p504_p5 = scmp.ne.s32.totalorder %s701_s4, %s503_s12  ;;  %p507_p6 = scmp.lt.u32.totalorder %s503_s12, %s701_s4 }
 0x106   :  { %p509_p7 = pnand %p507_p6, %p504_p5 }
 0x108   :  { %512 = shalt.err (!%p509_p7)
}
 0x109   :  { %s517_s17 = smov 384   ;;  %s518_s18 = smov 24  }
 0x10a   :  { %428 = dma.vmem_to_hbm [thread:$0]  %s423_s3, 4608, %s701_s4, [#allocation3], %s517_s17, %s517_s17, %s518_s18  }
 0x10b   :  { %513 = dma.done.wait [#allocation3], 4608  }
 0x10c   :  { %514 = vsyncadd [#allocation3], 4294962688 }
 0x10d   :  { %432 = vsyncpa [#allocation3], 1 }

</bundles_post_ra>
